<compile_context>
chip_gen: v7x
topology: tpu7x:2x2x1
jax: 0.10.0
libtpu: 0.0.40
codegen_flags: <defaults>
</compile_context>

<pallas_src>
import jax
import jax.numpy as jnp
from jax.experimental import pallas as pl
from jax.experimental.pallas import tpu as pltpu

NEG_SLOPE = 0.2
SUBLANE = 8  # f32 sublane count (second-to-last dim alignment)


def _linear_leakyrelu_kernel(x_ref, w_ref, b_ref, o_ref):
    # x_ref: (TB, IN), w_ref: (IN, OUT), b_ref: (1, OUT), o_ref: (TB, OUT)
    v1 = jnp.dot(x_ref[...], w_ref[...], preferred_element_type=jnp.float32) + b_ref[...]
    o_ref[...] = jnp.where(v1 > 0, v1, v1 * NEG_SLOPE).astype(o_ref.dtype)


def _round_up(n, m):
    return ((n + m - 1) // m) * m


def prepare_params(w, b):
    """One-time weight prep: torch-layout (OUT, IN) -> (IN, OUT); bias -> (1, OUT)."""
    w_t = jnp.asarray(w, jnp.float32).T
    bias = jnp.asarray(b, jnp.float32).reshape(1, -1)
    return w_t, bias


def linear_leakyrelu(x, w_t, bias, *, small_batch_max=512, block_b_max=4096):
    """x: (B, IN) f32, w_t: (IN, OUT) f32 (pre-transposed), bias: (1, OUT) f32 -> (B, OUT)."""
    B, IN = x.shape
    OUT = w_t.shape[1]

    if B <= small_batch_max:
        # Tiny batch: one straight-line invocation, whole arrays resident in VMEM.
        return pl.pallas_call(
            _linear_leakyrelu_kernel,
            out_shape=jax.ShapeDtypeStruct((B, OUT), jnp.float32),
            in_specs=[
                pl.BlockSpec(memory_space=pltpu.MemorySpace.VMEM),
                pl.BlockSpec(memory_space=pltpu.MemorySpace.VMEM),
                pl.BlockSpec(memory_space=pltpu.MemorySpace.VMEM),
            ],
            out_specs=pl.BlockSpec(memory_space=pltpu.MemorySpace.VMEM),
        )(x, w_t, bias)

    # Large batch: tile B with big blocks (amortize per-step overhead), keep W/bias
    # resident, force >= 2 blocks so the "parallel" axis can shard across v7x TCs.
    block_b = min(block_b_max, _round_up(pl.cdiv(B, 2), SUBLANE))
    grid = (pl.cdiv(B, block_b),)  # ragged last block handled by Pallas masking
    return pl.pallas_call(
        _linear_leakyrelu_kernel,
        out_shape=jax.ShapeDtypeStruct((B, OUT), jnp.float32),
        grid=grid,
        in_specs=[
            pl.BlockSpec((block_b, IN), lambda i: (i, 0)),
            pl.BlockSpec((IN, OUT), lambda i: (0, 0)),   # full-dim block (allowed)
            pl.BlockSpec((1, OUT), lambda i: (0, 0)),    # full-dim block (allowed)
        ],
        out_specs=pl.BlockSpec((block_b, OUT), lambda i: (i, 0)),
        compiler_params=pltpu.CompilerParams(
            dimension_semantics=("parallel",),
        ),
    )(x, w_t, bias)


def _reference(x, w, b):
    v1 = x @ w.T + b
    return jnp.where(v1 > 0, v1, v1 * NEG_SLOPE)


if __name__ == "__main__":
    key = jax.random.PRNGKey(0)
    kx, kw, kb, kx2 = jax.random.split(key, 4)

    IN, OUT, B = 10, 10, 1

    # Deterministic params (mimics torch.nn.Linear uniform(-1/sqrt(in), 1/sqrt(in)))
    bound = 1.0 / (IN ** 0.5)
    w = jax.random.uniform(kw, (OUT, IN), jnp.float32, -bound, bound)  # torch layout (out, in)
    b = jax.random.uniform(kb, (OUT,), jnp.float32, -bound, bound)

    # One-time weight preparation (hoisted out of the per-call path).
    w_t, bias = prepare_params(w, b)

    # Original module's input shape: (1, 10) -> gridless small-batch path.
    x1 = jax.random.normal(kx, (B, IN), jnp.float32)
    out = linear_leakyrelu(x1, w_t, bias)
    jax.block_until_ready(out)
    assert out.shape == (B, OUT)
    assert jnp.allclose(out, _reference(x1, w, b), atol=1e-5, rtol=1e-5)

    # Larger batch -> tiled grid path (2 parallel blocks, ragged last block).
    x_big = jax.random.normal(kx2, (3000, IN), jnp.float32)
    out_big = linear_leakyrelu(x_big, w_t, bias)
    jax.block_until_ready(out_big)
    assert out_big.shape == (3000, OUT)
    assert jnp.allclose(out_big, _reference(x_big, w, b), atol=1e-5, rtol=1e-5)

    print("KERNEL_OK")
</pallas_src>

<mosaic_0001>
module attributes {stable_mosaic.version = 11 : i64} {
  func.func @_linear_leakyrelu_kernel(%arg0: memref<1x10xf32, #tpu.memory_space<vmem>>, %arg1: memref<10x10xf32, #tpu.memory_space<vmem>>, %arg2: memref<1x10xf32, #tpu.memory_space<vmem>>, %arg3: memref<1x10xf32, #tpu.memory_space<vmem>>) attributes {dimension_semantics = [], scalar_prefetch = 0 : i64, scratch_operands = 0 : i64, tpu.core_type = #tpu.core_type<tc>} {
    %c0 = arith.constant 0 : index
    %c0_0 = arith.constant 0 : index
    %0 = vector.load %arg0[%c0, %c0_0] : memref<1x10xf32, #tpu.memory_space<vmem>>, vector<1x10xf32>
    %c0_1 = arith.constant 0 : index
    %c0_2 = arith.constant 0 : index
    %1 = vector.load %arg1[%c0_1, %c0_2] : memref<10x10xf32, #tpu.memory_space<vmem>>, vector<10x10xf32>
    %cst = arith.constant dense<0.000000e+00> : vector<1x10xf32>
    %2 = tpu.matmul %0, %1, %cst {dimension_numbers = #tpu.dot_dimension_numbers<[1], [0], [0], [1], [0, 0, 1, 1], [], []>} : vector<1x10xf32>, vector<10x10xf32>, vector<1x10xf32> -> vector<1x10xf32>
    %c0_3 = arith.constant 0 : index
    %c0_4 = arith.constant 0 : index
    %3 = vector.load %arg2[%c0_3, %c0_4] : memref<1x10xf32, #tpu.memory_space<vmem>>, vector<1x10xf32>
    %4 = arith.addf %2, %3 : vector<1x10xf32>
    %cst_5 = arith.constant 0.000000e+00 : f32
    %5 = vector.broadcast %cst_5 : f32 to vector<1x10xf32>
    %6 = arith.cmpf ogt, %4, %5 : vector<1x10xf32>
    %cst_6 = arith.constant 2.000000e-01 : f32
    %7 = vector.broadcast %cst_6 : f32 to vector<1x10xf32>
    %8 = arith.mulf %4, %7 : vector<1x10xf32>
    %9 = arith.select %6, %4, %8 : vector<1x10xi1>, vector<1x10xf32>
    %c0_7 = arith.constant 0 : index
    %c0_8 = arith.constant 0 : index
    %10 = vector.load %arg3[%c0_7, %c0_8] : memref<1x10xf32, #tpu.memory_space<vmem>>, vector<1x10xf32>
    tpu.vector_store %arg3[%c0_7, %c0_8], %9 {strides = array<i32>} : memref<1x10xf32, #tpu.memory_space<vmem>>, vector<1x10xf32>,
    return
  }
}

</mosaic_0001>

<bundles_post_ra>
// kernel: tpu_custom_call.1
= control target key start
LH: loop header
LB: loop body
LE: loop exit
PB: predicated region body
PF: predicated region fallthrough
CT: control target
= control target key end

     0   :  { %8 = vsyncpa [#allocation3], 0  ;;  %s316_s0 = inlined_call_operand.hbm [shape: f32[1,10], index: 0, kind: input, shape index: {}]   ;;  %s317_s1 = inlined_call_operand.hbm [shape: f32[10,10], index: 1, kind: input, shape index: {}]   ;;  %s318_s2 = inlined_call_operand.vmem [shape: f32[1,10], index: 2, kind: input, shape index: {}]   ;;  %s319_s3 = inlined_call_operand.hbm [shape: f32[1,10], index: 3, kind: output, shape index: {}]  }
   0x1   :  { %9 = vsyncpa [#allocation6], 0 }
   0x2   :  { %10 = vsyncpa [#allocation4], 0  ;;  %s241_s12 = smov [#allocation2]   ;;  %s242_s14 = smov [#allocation5]  }
   0x3   :  { %s17_s13 = sshll.u32 %s241_s12, 4  ;;  %s26_s15 = sshll.u32 %s242_s14, 4  ;;  %s18_s13 = int_to_ptr.vmem [resolvable:$true] %s17_s13  ;;  %s270_s15 = int_to_ptr.vmem [resolvable:$true] %s26_s15 }
   0x4   :  { %s169_s18 = scalar_lea.hbm %s316_s0, 16 }
   0x5   :  { %p170_p0 = scmp.ne.s32.totalorder %s316_s0, %s169_s18  ;;  %p173_p1 = scmp.lt.u32.totalorder %s169_s18, %s316_s0 }
   0x7   :  { %p175_p2 = pnand %p173_p1, %p170_p0 }
   0x9   :  { %178 = shalt.err (!%p175_p2)
}
   0xa   :  { %s179_s23 = scalar_lea.vmem %s18_s13, 16  ;;  %s183_s24 = scalar_lea.vmem %s18_s13, 32 }
   0xb   :  { %p180_p3 = scmp.ne.s32.totalorder %s18_s13, %s179_s23  ;;  %p184_p4 = scmp.lt.s32.totalorder %s18_s13, %s18_s13 }
   0xc   :  { %p185_p5 = scmp.lt.s32.totalorder %s183_s24, %s179_s23 }
   0xe   :  { %p186_p6 = por %p185_p5, %p184_p4 }
  0x10   :  { %p187_p7 = pnand %p186_p6, %p180_p3 }
  0x12   :  { %190 = shalt.err (!%p187_p7)
}
  0x13   :  { %20 = dma.hbm_to_vmem [thread:$0]  %s316_s0, 16, %s18_s13, [#allocation3]  }
  0x14   :  { %s191_s29 = scalar_lea.hbm %s317_s1, 256 }
  0x15   :  { %p192_p8 = scmp.ne.s32.totalorder %s317_s1, %s191_s29  ;;  %p195_p9 = scmp.lt.u32.totalorder %s191_s29, %s317_s1 }
  0x17   :  { %p197_p10 = pnand %p195_p9, %p192_p8 }
  0x19   :  { %200 = shalt.err (!%p197_p10)
}
  0x1a   :  { %s201_s7 = scalar_lea.vmem %s270_s15, 256  ;;  %p206_p12 = scmp.lt.s32.totalorder %s270_s15, %s270_s15 }
  0x1b   :  { %p202_p11 = scmp.ne.s32.totalorder %s270_s15, %s201_s7  ;;  %p207_p13 = scmp.lt.s32.totalorder %s201_s7, %s201_s7 }
  0x1d   :  { %p208_p0 = por %p207_p13, %p206_p12 }
  0x1f   :  { %p209_p1 = pnand %p208_p0, %p202_p11 }
  0x21   :  { %212 = shalt.err (!%p209_p1)
}
  0x22   :  { %s243_s0 = smov 128   ;;  %s244_s8 = smov 8  }
  0x23   :  { %32 = dma.hbm_to_vmem [thread:$0]  %s317_s1, 256, %s270_s15, [#allocation6], %s243_s0, %s243_s0, %s244_s8  }
  0x24   :  { %235 = dma.done.wait [#allocation3], 16  }
  0x25   :  { %236 = vsyncadd [#allocation3], 4294967280 }
  0x26   :  { %237 = dma.done.wait [#allocation6], 256  }
  0x27   :  { %238 = vsyncadd [#allocation6], 4294967040  ;;  %v245_v0 = vmov 0.0|0.0   ;;  %vm246_vm0 = vmmov 0   ;;  %v247_v1 = vmov 0.0   ;;  %vm49_vm1 = vcmask 1041408  }
  0x28   :  { %156 = vmatprep.subr.bf16.mxu0 %v245_v0  ;;  %153 = vmatprep.mubr.msk.f32.mxu0 %vm246_vm0, %v247_v1  ;;  %v42_v2 = vld [vmem:[#allocation5] sm:$0xff]  ;;  %v43_v3 = vld [vmem:[#allocation5 + $0x8] sm:$0x3]  ;;  %vm248_vm2 = vmmov 1   ;;  %v41_v5 = vld [vmem:[#allocation2] sm:$0x1] }
  0x29   :  { %vm158_vm3 = vmpackc.low %vm49_vm1, %vm248_vm2  ;;  %v157_v4 = vpack.c.bf16 %v43_v3, %v42_v2  ;;  %vm45_vm4 = vcmask 80896   ;;  %v44_v6 = vld [vmem:[%s318_s2] sm:$0x1]  ;;  %s249_s12 = smov [#allocation7]   ;;  %vm126_vm6 = vcmask 73728  }
  0x2a   :  { %s134_s13 = sshll.u32 %s249_s12, 4  ;;  %s135_s13 = int_to_ptr.vmem [resolvable:$true] %s134_s13 }
  0x2b   :  { %159 = vmatpush3.bf16.msk.msra.mxu0 %vm158_vm3, %v157_v4  ;;  %s213_s14 = scalar_lea.vmem %s135_s13, 16  ;;  %s217_s15 = scalar_lea.vmem %s135_s13, 32 }
  0x2c   :  { %p214_p2 = scmp.ne.s32.totalorder %s135_s13, %s213_s14  ;;  %p218_p3 = scmp.lt.s32.totalorder %s135_s13, %s135_s13 }
  0x2d   :  { %p219_p4 = scmp.lt.s32.totalorder %s217_s15, %s213_s14 }
  0x2e   :  { %154 = vmatmul.mubr.msk.f32.vlgmr.msra.gmra.mrb[0].mxu0 %vm45_vm4, %v41_v5 }
  0x2f   :  { %p220_p5 = por %p219_p4, %p218_p3 }
  0x31   :  { %p221_p6 = pnand %p220_p5, %p214_p2 }
 0x101   :  { %v119_v7 = vpop.f32.mrb[0].mxu0 }
 0x102   :  { %v120_v8 = vadd.f32 %v119_v7, %v44_v6  ;;  %v155_v9 = vpop.f32.mrb[1].mxu0 }
 0x104   :  { %vm123_vm5 = vcmp.gt.f32.partialorder %v120_v8, 0.0  ;;  %v124_v10 = vmul.f32 0.2, %v120_v8 }
 0x106   :  { %v125_v11 = vsel %vm123_vm5, %v120_v8, %v124_v10 }
 0x107   :  { %127 = vst.msk [vmem:[#allocation7] sm:$0x1] %vm126_vm6, %v125_v11 }
 0x108   :  { %224 = shalt.err (!%p221_p6)
}
 0x109   :  { %s225_s17 = scalar_lea.hbm %s319_s3, 16 }
 0x10a   :  { %p226_p7 = scmp.ne.s32.totalorder %s319_s3, %s225_s17  ;;  %p229_p8 = scmp.lt.u32.totalorder %s225_s17, %s319_s3 }
 0x10c   :  { %p231_p9 = pnand %p229_p8, %p226_p7 }
 0x10e   :  { %234 = shalt.err (!%p231_p9)
}
 0x10f   :  { %137 = dma.vmem_to_hbm [thread:$0]  %s135_s13, 16, %s319_s3, [#allocation4]  }
 0x110   :  { %239 = dma.done.wait [#allocation4], 16  }
 0x111   :  { %240 = vsyncadd [#allocation4], 4294967280 }
 0x112   :  { %141 = vsyncpa [#allocation3], 1 }
 0x113   :  { %142 = vsyncpa [#allocation6], 1 }
 0x114   :  { %143 = vsyncpa [#allocation4], 1 }

</bundles_post_ra>
